<compile_context>
chip_gen: v7x
topology: tpu7x:2x2x1
jax: 0.10.0
libtpu: 0.0.40
codegen_flags: <defaults>
</compile_context>

<pallas_src>
import jax
import jax.numpy as jnp
from jax import lax
from jax.experimental import pallas as pl
from jax.experimental.pallas import tpu as pltpu

BN_EPS = 1e-5                      # nn.BatchNorm2d default eps


# ----------------------------------------------------------------------------
# generation-aware VMEM budgeting
# ----------------------------------------------------------------------------
def _query_vmem_capacity():
    try:
        info = pltpu.get_tpu_info()
        cap = getattr(info, "vmem_capacity_bytes", None)
        if cap:
            return int(cap)
    except Exception:
        pass
    return 64 * 1024 * 1024        # conservative fallback (v7x per-core)


_VMEM_CAPACITY = _query_vmem_capacity()
# Scoped limit: half of physical, capped at 64 MiB (v5e/v6e -> 64 MiB, v7x -> 32 MiB).
_VMEM_LIMIT = min(_VMEM_CAPACITY // 2, 64 * 1024 * 1024)
# Per-block budget: in+out double-buffered (~4 live big blocks) plus slack.
_BLOCK_BUDGET = max(2 * 1024 * 1024, _VMEM_LIMIT // 12)


# ----------------------------------------------------------------------------
# tiling helpers
# ----------------------------------------------------------------------------
def _pick_tile(extent, target, quantum):
    """Largest divisor of `extent` that is <= target and a multiple of `quantum`,
    falling back to the full extent (exact tiling => no edge masking needed).
    TODO(synk): non-128-multiple spatial sizes fall back to a single full-extent
    block; a cdiv grid with in-kernel masking would avoid that for huge H*W."""
    if extent <= target:
        return extent
    start = (target // quantum) * quantum
    for t in range(start, quantum - 1, -quantum):
        if extent % t == 0:
            return t
    return extent


def _lane_target(rows, itemsize=4):
    """Lane-tile target so one block stays under the per-block VMEM budget."""
    t = _BLOCK_BUDGET // max(1, rows * itemsize)
    return max(128, min(4096, (t // 128) * 128))


# ----------------------------------------------------------------------------
# Pallas kernels
# ----------------------------------------------------------------------------
def _lp_stats_kernel(x_ref, sum_ref, sq_ref, acc_s, acc_q):
    """Per-row sum / sum-of-squares of the lowpass, accumulated over the
    lane-tile grid axis.  x_ref: (TR, L)."""
    j = pl.program_id(1)

    @pl.when(j == 0)
    def _():
        acc_s[...] = jnp.zeros_like(acc_s)
        acc_q[...] = jnp.zeros_like(acc_q)

    x = x_ref[...].astype(jnp.float32)            # f32 accumulation always
    acc_s[...] += jnp.sum(x, axis=1, keepdims=True)
    acc_q[...] += jnp.sum(x * x, axis=1, keepdims=True)

    @pl.when(j == pl.num_programs(1) - 1)
    def _():
        sum_ref[...] = acc_s[...]
        sq_ref[...] = acc_q[...]


def _affine_relu_kernel(x_ref, scale_ref, shift_ref, o_ref):
    """y = relu(x * scale + shift); scale/shift are per-row (TR, 1) f32."""
    x = x_ref[...].astype(jnp.float32)
    y = jnp.maximum(x * scale_ref[...] + shift_ref[...], 0.0)
    o_ref[...] = y.astype(o_ref.dtype)


def _pair_mag_sq(x):
    """x: (TR, 2L) f32 with lanes interleaved as [re, im, re, im, ...].
    Returns (re^2 + im^2) replicated at both lanes of each pair plus the
    even-lane mask.  Uses XLU lane rotations (free slot in a DMA-bound kernel);
    the wrap-around lanes are never selected, so the rotate wrap is harmless."""
    width = x.shape[-1]
    y = x * x
    z = y + pltpu.roll(y, 1, axis=1)              # odd lanes: re^2 + im^2
    zl = pltpu.roll(z, width - 1, axis=1)         # == roll(z, -1): even lanes
    lane = lax.broadcasted_iota(jnp.int32, y.shape, 1)
    is_even = (lane & 1) == 0
    r2 = jnp.where(is_even, zl, z)
    return r2, is_even


def _bp_stats_kernel(x_ref, sum_ref, sq_ref, acc_s, acc_q):
    """Per-row sum / sum-of-squares of the bandpass magnitude, on the
    interleaved (TR, 2L) layout.  Each magnitude is materialised at both lanes
    of its pair, so the caller uses a doubled sample count."""
    j = pl.program_id(1)

    @pl.when(j == 0)
    def _():
        acc_s[...] = jnp.zeros_like(acc_s)
        acc_q[...] = jnp.zeros_like(acc_q)

    x = x_ref[...].astype(jnp.float32)
    r2, _ = _pair_mag_sq(x)
    acc_s[...] += jnp.sum(jnp.sqrt(r2), axis=1, keepdims=True)
    acc_q[...] += jnp.sum(r2, axis=1, keepdims=True)

    @pl.when(j == pl.num_programs(1) - 1)
    def _():
        sum_ref[...] = acc_s[...]
        sq_ref[...] = acc_q[...]


def _bp_apply_kernel(x_ref, scale_ref, shift_ref, o_ref):
    """BN+ReLU on the magnitude, re-projected onto the original phase, done
    directly on the interleaved (TR, 2L) layout so the output store is one
    full-tile unmasked write.  cos/sin(atan2) are realised as re/r and im/r
    via a single exact rsqrt (identical semantics; atan2(0,0)=0 -> cos=1,
    sin=0, matching PyTorch)."""
    # TODO(synk): dtcwt_gainlayer's `mag` uses a smoothed sqrt only for its
    # backward pass; the forward magnitude below matches plain sqrt(re^2+im^2).
    x = x_ref[...].astype(jnp.float32)
    r2, is_even = _pair_mag_sq(x)
    nonzero = r2 > 0.0
    inv_r = lax.rsqrt(jnp.where(nonzero, r2, 1.0))
    r = r2 * inv_r
    r_new = jnp.maximum(r * scale_ref[...] + shift_ref[...], 0.0)
    factor = r_new * inv_r                        # r_new / r
    out = jnp.where(nonzero, x * factor, jnp.where(is_even, r_new, 0.0))
    o_ref[...] = out.astype(o_ref.dtype)


def _relu_kernel(x_ref, o_ref):
    o_ref[...] = jnp.maximum(x_ref[...], 0.0)


# ----------------------------------------------------------------------------
# Wrappers
# ----------------------------------------------------------------------------
def _bn_scale_shift(psum_rows, psq_rows, n_batch, count, gamma, beta):
    """Tiny per-channel math (C elements) between the two phases, then a tiny
    per-row broadcast (row = n*C + c).  Training-mode BN: biased variance.
    TODO(synk): could be fused into the apply kernel to save one XLA dispatch
    at deep DTCWT levels where H*W is small."""
    C = gamma.shape[0]
    s = psum_rows.reshape(n_batch, C).sum(axis=0)
    q = psq_rows.reshape(n_batch, C).sum(axis=0)
    mean = s / count
    var = jnp.maximum(q / count - mean * mean, 0.0)
    inv = lax.rsqrt(var + BN_EPS)
    scale = gamma.astype(jnp.float32) * inv
    shift = beta.astype(jnp.float32) - mean * scale
    scale_rows = jnp.tile(scale, n_batch).reshape(-1, 1)
    shift_rows = jnp.tile(shift, n_batch).reshape(-1, 1)
    return scale_rows, shift_rows


def _bn_relu_2d(x2, n_batch, gamma, beta, count, stats_kernel, apply_kernel):
    """Two-phase tiled BN+nonlinearity on a 2-D (rows, lanes) layout."""
    rows, lanes = x2.shape
    TR = _pick_tile(rows, 256, 8)
    L = _pick_tile(lanes, _lane_target(TR, x2.dtype.itemsize), 128)
    grid = (rows // TR, lanes // L)

    x_spec = pl.BlockSpec((TR, L), lambda i, j: (i, j))
    stat_spec = pl.BlockSpec((TR, 1), lambda i, j: (i, 0))

    psum, psq = pl.pallas_call(
        stats_kernel,
        out_shape=(jax.ShapeDtypeStruct((rows, 1), jnp.float32),
                   jax.ShapeDtypeStruct((rows, 1), jnp.float32)),
        grid=grid,
        in_specs=[x_spec],
        out_specs=(stat_spec, stat_spec),
        scratch_shapes=[pltpu.VMEM((TR, 1), jnp.float32),
                        pltpu.VMEM((TR, 1), jnp.float32)],
        compiler_params=pltpu.CompilerParams(
            dimension_semantics=("parallel", "arbitrary"),
            vmem_limit_bytes=_VMEM_LIMIT),
    )(x2)

    scale_rows, shift_rows = _bn_scale_shift(psum, psq, n_batch, count, gamma, beta)

    out = pl.pallas_call(
        apply_kernel,
        out_shape=jax.ShapeDtypeStruct((rows, lanes), x2.dtype),
        grid=grid,
        in_specs=[x_spec, stat_spec, stat_spec],
        out_specs=x_spec,
        compiler_params=pltpu.CompilerParams(
            dimension_semantics=("parallel", "parallel"),
            vmem_limit_bytes=_VMEM_LIMIT),
    )(x2, scale_rows, shift_rows)
    return out


def bn_relu_lowpass(yl, gamma, beta):
    N, C, H, W = yl.shape
    HW = H * W
    x2 = yl.reshape(N * C, HW)                    # free reshape, batch folded into rows
    out = _bn_relu_2d(x2, N, gamma, beta, float(N * HW),
                      _lp_stats_kernel, _affine_relu_kernel)
    return out.reshape(N, C, H, W)


def bn_relu_bandpass(yh, gamma, beta):
    N, C, O, H, W, _ = yh.shape                   # O == 6 orientations
    CC, HW = C * O, H * W
    # Native interleaved layout (free reshape, NO transposes): row = n*6C + c*6 + o,
    # lanes = [re, im, re, im, ...].  Channel index matches PyTorch's
    # x.view(s0, s1*s2, s3, s4, s5).
    x2 = yh.reshape(N * CC, 2 * HW)
    # Every magnitude appears at both lanes of its pair inside the kernels,
    # so the effective per-channel sample count is doubled.
    out = _bn_relu_2d(x2, N, gamma, beta, float(2 * N * HW),
                      _bp_stats_kernel, _bp_apply_kernel)
    return out.reshape(N, C, O, H, W, 2)


def relu_pallas(x):
    """Elementwise ReLU: lane-dense tiles, cdiv grid with masked edge tiles."""
    n = x.size
    if n == 0:
        return x
    flat = x.reshape(-1)
    pad = (-n) % 128
    if pad:
        # TODO(synk): rare non-128-multiple path pays one pad/slice copy.
        flat = jnp.pad(flat, (0, pad))
    m = flat.size
    K = _pick_tile(m, 4096, 128)                  # 128 always divides m here
    R = m // K
    itemsize = flat.dtype.itemsize
    TR = min(R, max(8, (_BLOCK_BUDGET // (K * itemsize) // 8) * 8))
    x2 = flat.reshape(R, K)
    out = pl.pallas_call(
        _relu_kernel,
        out_shape=jax.ShapeDtypeStruct((R, K), x2.dtype),
        grid=(pl.cdiv(R, TR),),
        in_specs=[pl.BlockSpec((TR, K), lambda i: (i, 0))],
        out_specs=pl.BlockSpec((TR, K), lambda i: (i, 0)),
        compiler_params=pltpu.CompilerParams(
            dimension_semantics=("parallel",),
            vmem_limit_bytes=_VMEM_LIMIT),
    )(x2)
    out = out.reshape(-1)
    if pad:
        out = out[:n]
    return out.reshape(x.shape)


# ----------------------------------------------------------------------------
# Module
# ----------------------------------------------------------------------------
class WaveNonLinearity:
    """JAX/Pallas port of dtcwt_gainlayer WaveNonLinearity (subset of options).

    Supported nonlinearities: 'none', 'relu', 'relu2'.
    BN affine params are initialized deterministically from a PRNG key
    (gamma ~ 1 + 0.1*N(0,1), beta ~ 0.05*N(0,1)); running-stat updates (a
    training-time side effect) are not reproduced.
    """

    def __init__(self, C, lp='none', bp=('none',), key=None):
        if key is None:
            key = jax.random.PRNGKey(0)
        self.C = C
        keys = jax.random.split(key, 2 * (1 + len(bp)))

        def make_bn_params(nchan, k1, k2):
            gamma = 1.0 + 0.1 * jax.random.normal(k1, (nchan,), jnp.float32)
            beta = 0.05 * jax.random.normal(k2, (nchan,), jnp.float32)
            return gamma, beta

        if lp in (None, 'none'):
            self.lp = ('none', None)
        elif lp == 'relu':
            self.lp = ('relu', None)
        elif lp == 'relu2':
            self.lp = ('relu2', make_bn_params(C, keys[0], keys[1]))
        else:
            raise ValueError(f'Unsupported lowpass nonlinearity {lp}')
        # TODO(synk): 'softshrink', '(hard|soft)shrink_std' variants not ported
        # (their dependent classes were not provided).

        self.bp = []
        for j, b in enumerate(bp):
            k1, k2 = keys[2 + 2 * j], keys[3 + 2 * j]
            if b in (None, 'none'):
                self.bp.append(('none', None))
            elif b == 'relu':
                self.bp.append(('relu', None))
            elif b == 'relu2':
                self.bp.append(('relu2', make_bn_params(6 * C, k1, k2)))
            else:
                raise ValueError(f'Unsupported bandpass nonlinearity {b}')

    @staticmethod
    def _apply_lp(kind, params, yl):
        if kind == 'none':
            return yl
        if kind == 'relu':
            return relu_pallas(yl)
        gamma, beta = params
        return bn_relu_lowpass(yl, gamma, beta)

    @staticmethod
    def _apply_bp(kind, params, yh):
        if kind == 'none':
            return yh
        if kind == 'relu':
            return relu_pallas(yh)
        gamma, beta = params
        return bn_relu_bandpass(yh, gamma, beta)

    def __call__(self, x):
        yl, yh = x
        yl = self._apply_lp(self.lp[0], self.lp[1], yl)
        out_h = []
        for (kind, params), y in zip(self.bp, yh):
            if y.shape == (0,):        # mirrors `y.shape != torch.Size([0])`
                out_h.append(y)
            else:
                out_h.append(self._apply_bp(kind, params, y))
        return (yl, out_h)


# ----------------------------------------------------------------------------
# Pure-JAX references (forward semantics of the PyTorch module)
# ----------------------------------------------------------------------------
def _ref_bn_relu_lp(yl, gamma, beta):
    mean = jnp.mean(yl, axis=(0, 2, 3), keepdims=True)
    var = jnp.mean((yl - mean) ** 2, axis=(0, 2, 3), keepdims=True)
    y = ((yl - mean) / jnp.sqrt(var + BN_EPS) * gamma.reshape(1, -1, 1, 1)
         + beta.reshape(1, -1, 1, 1))
    return jnp.maximum(y, 0.0)


def _ref_bn_relu_bp(yh, gamma, beta):
    N, C, O, H, W, _ = yh.shape
    x = yh.reshape(N, C * O, H, W, 2)
    re, im = x[..., 0], x[..., 1]
    theta = jnp.arctan2(im, re)
    r = jnp.sqrt(re * re + im * im)
    mean = jnp.mean(r, axis=(0, 2, 3), keepdims=True)
    var = jnp.mean((r - mean) ** 2, axis=(0, 2, 3), keepdims=True)
    r_new = jnp.maximum((r - mean) / jnp.sqrt(var + BN_EPS)
                        * gamma.reshape(1, -1, 1, 1)
                        + beta.reshape(1, -1, 1, 1), 0.0)
    y = jnp.stack([r_new * jnp.cos(theta), r_new * jnp.sin(theta)], axis=-1)
    return y.reshape(N, C, O, H, W, 2)


# ----------------------------------------------------------------------------
if __name__ == "__main__":
    key = jax.random.PRNGKey(0)
    k_yl, k_h0, k_h1, k_params = jax.random.split(key, 4)

    N, C, H, W = 2, 4, 16, 16
    yl = jax.random.normal(k_yl, (N, C, H, W), jnp.float32)
    yh = [
        jax.random.normal(k_h0, (N, C, 6, H, W, 2), jnp.float32),
        jax.random.normal(k_h1, (N, C, 6, H // 2, W // 2, 2), jnp.float32),
        jnp.zeros((0,), jnp.float32),   # empty scale -> passed through untouched
    ]

    model = WaveNonLinearity(C, lp='relu2', bp=('relu2', 'relu', 'none'),
                             key=k_params)

    out_l, out_h = model((yl, yh))
    jax.block_until_ready(out_l)
    for o in out_h:
        jax.block_until_ready(o)

    # Shape checks
    assert out_l.shape == yl.shape
    assert out_h[0].shape == yh[0].shape
    assert out_h[1].shape == yh[1].shape
    assert out_h[2].shape == (0,)

    # Numerical checks against pure-JAX references.  Exact rsqrt-based phase
    # re-projection allows a much tighter tolerance than the old approx path.
    ref_l = _ref_bn_relu_lp(yl, *model.lp[1])
    ref_h0 = _ref_bn_relu_bp(yh[0], *model.bp[0][1])
    ref_h1 = jnp.maximum(yh[1], 0.0)
    assert jnp.allclose(out_l, ref_l, atol=2e-3, rtol=2e-3)
    assert jnp.allclose(out_h[0], ref_h0, atol=2e-3, rtol=2e-3)
    assert jnp.allclose(out_h[1], ref_h1, atol=1e-6)

    print("KERNEL_OK")
</pallas_src>

<mosaic_0001>
module attributes {stable_mosaic.version = 11 : i64} {
  func.func @_lp_stats_kernel(%arg0: i32, %arg1: i32, %arg2: memref<8x256xf32, #tpu.memory_space<vmem>>, %arg3: memref<8x1xf32, #tpu.memory_space<vmem>>, %arg4: memref<8x1xf32, #tpu.memory_space<vmem>>, %arg5: memref<8x1xf32, #tpu.memory_space<vmem>>, %arg6: memref<8x1xf32, #tpu.memory_space<vmem>>) attributes {dimension_semantics = [#tpu.dimension_semantics<parallel>, #tpu.dimension_semantics<arbitrary>], iteration_bounds = array<i64: 1, 1>, scalar_prefetch = 0 : i64, scratch_operands = 2 : i64, tpu.core_type = #tpu.core_type<tc>, window_params = [{transform_indices = @transform_0, window_bounds = array<i64: 8, 256>}, {transform_indices = @transform_1, window_bounds = array<i64: 8, 1>}, {transform_indices = @transform_2, window_bounds = array<i64: 8, 1>}]} {
    %c0_i32 = arith.constant 0 : i32
    %0 = arith.cmpi eq, %arg1, %c0_i32 : i32
    %1 = arith.extui %0 : i1 to i32
    %c0_i32_0 = arith.constant 0 : i32
    %2 = arith.cmpi ne, %1, %c0_i32_0 : i32
    scf.if %2 {
      %cst_13 = arith.constant 0.000000e+00 : f32
      %18 = vector.broadcast %cst_13 : f32 to vector<8x1xf32>
      %c0_14 = arith.constant 0 : index
      %c0_15 = arith.constant 0 : index
      %19 = vector.load %arg5[%c0_14, %c0_15] : memref<8x1xf32, #tpu.memory_space<vmem>>, vector<8x1xf32>
      tpu.vector_store %arg5[%c0_14, %c0_15], %18 {strides = array<i32>} : memref<8x1xf32, #tpu.memory_space<vmem>>, vector<8x1xf32>,
      %cst_16 = arith.constant 0.000000e+00 : f32
      %20 = vector.broadcast %cst_16 : f32 to vector<8x1xf32>
      %c0_17 = arith.constant 0 : index
      %c0_18 = arith.constant 0 : index
      %21 = vector.load %arg6[%c0_17, %c0_18] : memref<8x1xf32, #tpu.memory_space<vmem>>, vector<8x1xf32>
      tpu.vector_store %arg6[%c0_17, %c0_18], %20 {strides = array<i32>} : memref<8x1xf32, #tpu.memory_space<vmem>>, vector<8x1xf32>,
    } else {
    }
    %c0 = arith.constant 0 : index
    %c0_1 = arith.constant 0 : index
    %3 = vector.load %arg2[%c0, %c0_1] : memref<8x256xf32, #tpu.memory_space<vmem>>, vector<8x256xf32>
    %c0_2 = arith.constant 0 : index
    %c0_3 = arith.constant 0 : index
    %4 = vector.load %arg5[%c0_2, %c0_3] : memref<8x1xf32, #tpu.memory_space<vmem>>, vector<8x1xf32>
    %cst = arith.constant dense<0.000000e+00> : vector<8xf32>
    %5 = vector.multi_reduction <add>, %3, %cst [1] : vector<8x256xf32> to vector<8xf32>
    %6 = vector.shape_cast %5 : vector<8xf32> to vector<8x1xf32>
    %7 = arith.addf %4, %6 : vector<8x1xf32>
    %c0_4 = arith.constant 0 : index
    %c0_5 = arith.constant 0 : index
    %8 = vector.load %arg5[%c0_4, %c0_5] : memref<8x1xf32, #tpu.memory_space<vmem>>, vector<8x1xf32>
    tpu.vector_store %arg5[%c0_4, %c0_5], %7 {strides = array<i32>} : memref<8x1xf32, #tpu.memory_space<vmem>>, vector<8x1xf32>,
    %c0_6 = arith.constant 0 : index
    %c0_7 = arith.constant 0 : index
    %9 = vector.load %arg6[%c0_6, %c0_7] : memref<8x1xf32, #tpu.memory_space<vmem>>, vector<8x1xf32>
    %10 = arith.mulf %3, %3 : vector<8x256xf32>
    %cst_8 = arith.constant dense<0.000000e+00> : vector<8xf32>
    %11 = vector.multi_reduction <add>, %10, %cst_8 [1] : vector<8x256xf32> to vector<8xf32>
    %12 = vector.shape_cast %11 : vector<8xf32> to vector<8x1xf32>
    %13 = arith.addf %9, %12 : vector<8x1xf32>
    %c0_9 = arith.constant 0 : index
    %c0_10 = arith.constant 0 : index
    %14 = vector.load %arg6[%c0_9, %c0_10] : memref<8x1xf32, #tpu.memory_space<vmem>>, vector<8x1xf32>
    tpu.vector_store %arg6[%c0_9, %c0_10], %13 {strides = array<i32>} : memref<8x1xf32, #tpu.memory_space<vmem>>, vector<8x1xf32>,
    %c0_i32_11 = arith.constant 0 : i32
    %15 = arith.cmpi eq, %arg1, %c0_i32_11 : i32
    %16 = arith.extui %15 : i1 to i32
    %c0_i32_12 = arith.constant 0 : i32
    %17 = arith.cmpi ne, %16, %c0_i32_12 : i32
    scf.if %17 {
      %c0_13 = arith.constant 0 : index
      %c0_14 = arith.constant 0 : index
      %18 = vector.load %arg5[%c0_13, %c0_14] : memref<8x1xf32, #tpu.memory_space<vmem>>, vector<8x1xf32>
      %c0_15 = arith.constant 0 : index
      %c0_16 = arith.constant 0 : index
      %19 = vector.load %arg3[%c0_15, %c0_16] : memref<8x1xf32, #tpu.memory_space<vmem>>, vector<8x1xf32>
      tpu.vector_store %arg3[%c0_15, %c0_16], %18 {strides = array<i32>} : memref<8x1xf32, #tpu.memory_space<vmem>>, vector<8x1xf32>,
      %c0_17 = arith.constant 0 : index
      %c0_18 = arith.constant 0 : index
      %20 = vector.load %arg6[%c0_17, %c0_18] : memref<8x1xf32, #tpu.memory_space<vmem>>, vector<8x1xf32>
      %c0_19 = arith.constant 0 : index
      %c0_20 = arith.constant 0 : index
      %21 = vector.load %arg4[%c0_19, %c0_20] : memref<8x1xf32, #tpu.memory_space<vmem>>, vector<8x1xf32>
      tpu.vector_store %arg4[%c0_19, %c0_20], %20 {strides = array<i32>} : memref<8x1xf32, #tpu.memory_space<vmem>>, vector<8x1xf32>,
    } else {
    }
    return
  }
  func.func @transform_0(%arg0: i32, %arg1: i32) -> (i32, i32) {
    %c0_i32 = arith.constant 0 : i32
    return %arg0, %arg1 : i32, i32
  }
  func.func @transform_1(%arg0: i32, %arg1: i32) -> (i32, i32) {
    %c0_i32 = arith.constant 0 : i32
    %c0_i32_0 = arith.constant 0 : i32
    return %arg0, %c0_i32 : i32, i32
  }
  func.func @transform_2(%arg0: i32, %arg1: i32) -> (i32, i32) {
    %c0_i32 = arith.constant 0 : i32
    %c0_i32_0 = arith.constant 0 : i32
    return %arg0, %c0_i32 : i32, i32
  }
}

</mosaic_0001>

<bundles_post_ra>
// kernel: tpu_custom_call.1
= control target key start
LH: loop header
LB: loop body
LE: loop exit
PB: predicated region body
PF: predicated region fallthrough
CT: control target
= control target key end

     0   :  { %8 = vsyncpa [#allocation5], 0  ;;  %s88_s9 = smov [#allocation4]   ;;  %s129_s0 = inlined_call_operand.hbm [shape: f32[8,256], index: 0, kind: input, shape index: {}]   ;;  %s130_s1 = inlined_call_operand.vmem [shape: f32[8,1], index: 1, kind: output, shape index: {0}]   ;;  %s131_s2 = inlined_call_operand.vmem [shape: f32[8,1], index: 2, kind: output, shape index: {1}]  }
   0x1   :  { %s15_s10 = sshll.u32 %s88_s9, 4  ;;  %s64_s13 = scalar_lea.hbm %s129_s0, 256  ;;  %s16_s10 = int_to_ptr.vmem [resolvable:$true] %s15_s10 }
   0x2   :  { %p65_p0 = scmp.ne.s32.totalorder %s129_s0, %s64_s13  ;;  %p68_p1 = scmp.lt.u32.totalorder %s64_s13, %s129_s0 }
   0x4   :  { %p70_p2 = pnand %p68_p1, %p65_p0 }
   0x6   :  { %73 = shalt.err (!%p70_p2)
}
   0x7   :  { %s74_s18 = scalar_lea.vmem %s16_s10, 256  ;;  %p79_p4 = scmp.lt.s32.totalorder %s16_s10, %s16_s10 }
   0x8   :  { %p75_p3 = scmp.ne.s32.totalorder %s16_s10, %s74_s18  ;;  %p80_p5 = scmp.lt.s32.totalorder %s74_s18, %s74_s18 }
   0xa   :  { %p81_p6 = por %p80_p5, %p79_p4 }
   0xc   :  { %p82_p7 = pnand %p81_p6, %p75_p3 }
   0xe   :  { %85 = shalt.err (!%p82_p7)
}
   0xf   :  { %18 = dma.hbm_to_vmem [thread:$0]  %s129_s0, 256, %s16_s10, [#allocation5]  }
  0x10   :  { %86 = dma.done.wait [#allocation5], 256  }
  0x11   :  { %87 = vsyncadd [#allocation5], 4294967040  ;;  %vm26_vm0 = vcmask 7168   ;;  %v89_v0 = vmov 0.0   ;;  %v29_v1 = vld [vmem:[#allocation4] sm:$0xff]  ;;  %v30_v2 = vld [vmem:[#allocation4 + $0x8] sm:$0xff] }
  0x12   :  { %27 = vst.msk [vmem:[#allocation2] sm:$0xff] %vm26_vm0, %v89_v0  ;;  %28 = vst.msk [vmem:[#allocation3] sm:$0xff] %vm26_vm0, %v89_v0  ;;  %v32_v3 = vadd.f32 %v30_v2, %v29_v1  ;;  %v39_v4 = vmul.f32 %v29_v1, %v29_v1  ;;  %v40_v5 = vmul.f32 %v30_v2, %v30_v2 }
  0x14   :  { %33 = vadd.xlane.f32.xlu0 %v32_v3  ;;  %v41_v6 = vadd.f32 %v40_v5, %v39_v4 }
  0x18   :  { %42 = vadd.xlane.f32.xlu0 %v41_v6 }
  0x19   :  { %v31_v7 = vld [vmem:[#allocation2] sm:$0xff]  ;;  %v38_v10 = vld [vmem:[#allocation3] sm:$0xff] }
  0xa1   :  { %v34_v8 = vpop.xlane.xlu0 %33 }
  0xa2   :  { %v35_v9 = vadd.f32 %v34_v8, %v31_v7 }
  0xa4   :  { %37 = vst.msk [vmem:[#allocation2] sm:$0xff] %vm26_vm0, %v35_v9 }
  0xa5   :  { %v43_v11 = vpop.xlane.xlu0 %42 }
  0xa6   :  { %v44_v12 = vadd.f32 %v43_v11, %v38_v10 }
  0xa8   :  { %45 = vst.msk [vmem:[#allocation3] sm:$0xff] %vm26_vm0, %v44_v12 }
  0xab   :  { %v49_v13 = vld [vmem:[#allocation2] sm:$0xff] }
  0xac   :  { %50 = vst.msk [vmem:[%s130_s1] sm:$0xff] %vm26_vm0, %v49_v13 }
  0xaf   :  { %v51_v14 = vld [vmem:[#allocation3] sm:$0xff] }
  0xb0   :  { %52 = vst.msk [vmem:[%s131_s2] sm:$0xff] %vm26_vm0, %v51_v14 }
  0xb1   :  { %61 = vsyncpa [#allocation5], 1 }

</bundles_post_ra>
